<compile_context>
chip_gen: v7x
topology: tpu7x:2x2x1
jax: 0.10.0
libtpu: 0.0.40
codegen_flags: <defaults>
</compile_context>

<pallas_src>
import functools

import jax
import jax.numpy as jnp
from jax.experimental import pallas as pl
from jax.experimental.pallas import tpu as pltpu

BN_EPS = 1e-5
IMG_FEATS = 28 * 28          # 784
IMG_PAD = 896                # 7 * 128, lane-dense
HIDDEN = 64
HEAD_PAD = 128               # fused mu|logvar head padded to a full lane width

# packed-bias layout (all segment starts are multiples of 128)
BE_OFF, BD1_OFF, BH_OFF, BD2_OFF = 0, 128, 256, 384
BIAS_PACK = BD2_OFF + IMG_PAD    # 1280


def vae_kernel(x_ref, we_ref, wh_ref, wd1_ref, wd2_ref, bias_ref,
               out_ref, head_ref):
    # x tile: (TB, 896) bf16; weights bf16 (BN already folded); biases f32.
    be = bias_ref[:, BE_OFF:BE_OFF + HIDDEN]            # (1, 64)
    bd1 = bias_ref[:, BD1_OFF:BD1_OFF + HIDDEN]         # (1, 64)
    bh = bias_ref[:, BH_OFF:BH_OFF + HEAD_PAD]          # (1, 128)
    bd2 = bias_ref[:, BD2_OFF:BD2_OFF + IMG_PAD]        # (1, 896)

    x = x_ref[...]                                      # (TB, 896) bf16

    # encoder: Linear(784->64) with BN1 folded, + ReLU (f32 elementwise)
    h = jnp.dot(x, we_ref[...], preferred_element_type=jnp.float32) + be
    h = jnp.maximum(h, 0.0)                             # (TB, 64) f32

    # fused mu|logvar heads: Linear(64 -> 2L, padded to 128) + ReLU
    head = jnp.dot(h.astype(jnp.bfloat16), wh_ref[...],
                   preferred_element_type=jnp.float32) + bh
    head = jnp.maximum(head, 0.0)                       # (TB, 128) f32

    # reparameterize (eval mode): sample = mu.  wd1 rows for the logvar / pad
    # lanes are zero, so feeding the whole fused head through wd1 is exactly
    # mu @ wd1 (BN2 already folded into wd1/bd1).
    d = jnp.dot(head.astype(jnp.bfloat16), wd1_ref[...],
                preferred_element_type=jnp.float32) + bd1
    d = jnp.maximum(d, 0.0)                             # (TB, 64) f32

    logits = jnp.dot(d.astype(jnp.bfloat16), wd2_ref[...],
                     preferred_element_type=jnp.float32) + bd2
    out_ref[...] = jax.nn.sigmoid(logits)               # (TB, 896) f32
    head_ref[...] = head                                # (TB, 128) f32


def init_params(key, latent_size):
    """Deterministic synthetic parameters (PyTorch shapes, transposed weights)."""
    ks = jax.random.split(key, 6)

    def lin(k, fan_in, fan_out):
        bound = 1.0 / jnp.sqrt(fan_in)
        kw, kb = jax.random.split(k)
        w = jax.random.uniform(kw, (fan_in, fan_out), jnp.float32, -bound, bound)
        b = jax.random.uniform(kb, (1, fan_out), jnp.float32, -bound, bound)
        return w, b

    we, be = lin(ks[0], IMG_FEATS, HIDDEN)
    wmu, bmu = lin(ks[1], HIDDEN, latent_size)
    wlv, blv = lin(ks[2], HIDDEN, latent_size)
    wd1, bd1 = lin(ks[3], latent_size, HIDDEN)
    wd2, bd2 = lin(ks[4], HIDDEN, IMG_FEATS)

    # BatchNorm1d(64): gamma=1, beta=0, running_mean=0, running_var=1
    ones = jnp.ones((1, HIDDEN), jnp.float32)
    zeros = jnp.zeros((1, HIDDEN), jnp.float32)
    bn1 = (ones, zeros, zeros, ones)
    bn2 = (ones, zeros, zeros, ones)

    return dict(we=we, be=be, bn1=bn1, wmu=wmu, bmu=bmu, wlv=wlv, blv=blv,
                wd1=wd1, bd1=bd1, bn2=bn2, wd2=wd2, bd2=bd2)


def prepare_params(params, latent_size):
    """Wrapper-side prep: fold BN, fuse heads, pad to lane-dense, cast bf16."""
    assert 2 * latent_size <= HEAD_PAD
    g1, bt1, rm1, rv1 = params["bn1"]
    g2, bt2, rm2, rv2 = params["bn2"]

    def fold_bn(w, b, gamma, beta, rm, rv):
        s = gamma * jax.lax.rsqrt(rv + BN_EPS)           # (1, out)
        return w * s, b * s + (beta - rm * s)

    # encoder Linear(784,64) + BN1 folded; rows padded 784 -> 896
    we_f, be_f = fold_bn(params["we"], params["be"], g1, bt1, rm1, rv1)
    we_p = jnp.zeros((IMG_PAD, HIDDEN), jnp.float32).at[:IMG_FEATS].set(we_f)

    # fused mu|logvar head: (64, 2L) padded to (64, 128)
    wh = jnp.concatenate([params["wmu"], params["wlv"]], axis=1)
    bh = jnp.concatenate([params["bmu"], params["blv"]], axis=1)
    wh_p = jnp.zeros((HIDDEN, HEAD_PAD), jnp.float32)
    wh_p = wh_p.at[:, :2 * latent_size].set(wh)

    # decoder Linear(L,64) + BN2 folded; rows padded L -> 128 with zeros so
    # only the mu lanes of the fused head contribute (sample = mu, eval mode).
    wd1_f, bd1_f = fold_bn(params["wd1"], params["bd1"], g2, bt2, rm2, rv2)
    wd1_p = jnp.zeros((HEAD_PAD, HIDDEN), jnp.float32).at[:latent_size].set(wd1_f)

    # decoder Linear(64,784); cols padded 784 -> 896
    wd2_p = jnp.zeros((HIDDEN, IMG_PAD), jnp.float32)
    wd2_p = wd2_p.at[:, :IMG_FEATS].set(params["wd2"])

    # packed biases (f32) with 128-aligned segment starts
    bias = jnp.zeros((1, BIAS_PACK), jnp.float32)
    bias = bias.at[:, BE_OFF:BE_OFF + HIDDEN].set(be_f)
    bias = bias.at[:, BD1_OFF:BD1_OFF + HIDDEN].set(bd1_f)
    bias = bias.at[:, BH_OFF:BH_OFF + 2 * latent_size].set(bh)
    bias = bias.at[:, BD2_OFF:BD2_OFF + IMG_FEATS].set(params["bd2"])

    bf16 = jnp.bfloat16
    return dict(we=we_p.astype(bf16), wh=wh_p.astype(bf16),
                wd1=wd1_p.astype(bf16), wd2=wd2_p.astype(bf16), bias=bias)


def vae_forward(x_img, prep, *, latent_size, batch_tile=256):
    B = x_img.shape[0]
    L = latent_size
    x = x_img.reshape(B, IMG_FEATS).astype(jnp.float32)

    def round_up(n, m):
        return -(-n // m) * m

    tb = round_up(min(batch_tile, round_up(B, 8)), 8)
    b_pad = round_up(B, tb)
    nb = b_pad // tb

    x_p = jnp.pad(x, ((0, b_pad - B), (0, IMG_PAD - IMG_FEATS))).astype(jnp.bfloat16)

    weight_elems = (IMG_PAD * HIDDEN + HIDDEN * HEAD_PAD
                    + HEAD_PAD * HIDDEN + HIDDEN * IMG_PAD)
    flops = 2 * b_pad * weight_elems
    bytes_accessed = (b_pad * IMG_PAD * 2                 # x (bf16)
                      + weight_elems * 2                  # weights (bf16)
                      + BIAS_PACK * 4                     # packed biases
                      + b_pad * (IMG_PAD + HEAD_PAD) * 4)  # outputs (f32)

    recon_p, head_p = pl.pallas_call(
        vae_kernel,
        grid=(nb,),
        in_specs=[
            pl.BlockSpec((tb, IMG_PAD), lambda i: (i, 0)),       # x (batch-tiled)
            pl.BlockSpec((IMG_PAD, HIDDEN), lambda i: (0, 0)),   # we  (resident)
            pl.BlockSpec((HIDDEN, HEAD_PAD), lambda i: (0, 0)),  # wh  (resident)
            pl.BlockSpec((HEAD_PAD, HIDDEN), lambda i: (0, 0)),  # wd1 (resident)
            pl.BlockSpec((HIDDEN, IMG_PAD), lambda i: (0, 0)),   # wd2 (resident)
            pl.BlockSpec((1, BIAS_PACK), lambda i: (0, 0)),      # packed biases
        ],
        out_specs=(
            pl.BlockSpec((tb, IMG_PAD), lambda i: (i, 0)),
            pl.BlockSpec((tb, HEAD_PAD), lambda i: (i, 0)),
        ),
        out_shape=(
            jax.ShapeDtypeStruct((b_pad, IMG_PAD), jnp.float32),
            jax.ShapeDtypeStruct((b_pad, HEAD_PAD), jnp.float32),
        ),
        compiler_params=pltpu.CompilerParams(
            dimension_semantics=("parallel",)),
        cost_estimate=pl.CostEstimate(
            flops=flops,
            transcendentals=b_pad * IMG_PAD,
            bytes_accessed=bytes_accessed),
    )(x_p, prep["we"], prep["wh"], prep["wd1"], prep["wd2"], prep["bias"])

    recon = recon_p[:B, :IMG_FEATS]
    mu = head_p[:B, :L]
    logvar = head_p[:B, L:2 * L]
    return recon, mu, logvar


def vae_reference(x_img, params):
    """Pure-JAX f32 eval-mode reference of the PyTorch Net forward."""
    B = x_img.shape[0]
    x = x_img.reshape(B, IMG_FEATS).astype(jnp.float32)
    g1, bt1, rm1, rv1 = params["bn1"]
    g2, bt2, rm2, rv2 = params["bn2"]
    h = x @ params["we"] + params["be"]
    h = (h - rm1) * jax.lax.rsqrt(rv1 + BN_EPS) * g1 + bt1
    h = jnp.maximum(h, 0.0)
    mu = jnp.maximum(h @ params["wmu"] + params["bmu"], 0.0)
    lv = jnp.maximum(h @ params["wlv"] + params["blv"], 0.0)
    d = mu @ params["wd1"] + params["bd1"]          # eval: sample = mu
    d = (d - rm2) * jax.lax.rsqrt(rv2 + BN_EPS) * g2 + bt2
    d = jnp.maximum(d, 0.0)
    out = jax.nn.sigmoid(d @ params["wd2"] + params["bd2"])
    return out, mu, lv


if __name__ == "__main__":
    latent_size = 32
    B = 16
    key = jax.random.PRNGKey(0)
    k_params, k_x = jax.random.split(key)

    params = init_params(k_params, latent_size)
    prep = prepare_params(params, latent_size)
    x_img = jax.random.normal(k_x, (B, 1, 28, 28), jnp.float32)  # NCHW like PyTorch

    # batch_tile=8 -> grid=(2,), exercising the batch-tiled pipeline at small B.
    fwd = jax.jit(functools.partial(vae_forward, latent_size=latent_size,
                                    batch_tile=8))
    result, mu, logvar = jax.block_until_ready(fwd(x_img, prep))

    assert result.shape == (B, IMG_FEATS)
    assert mu.shape == (B, latent_size)
    assert logvar.shape == (B, latent_size)
    assert bool(jnp.all(jnp.isfinite(result)))

    # Validate against the f32 reference (bf16 weights -> loose tolerance).
    ref_out, ref_mu, ref_lv = vae_reference(x_img, params)
    assert float(jnp.max(jnp.abs(result - ref_out))) < 5e-2
    assert float(jnp.max(jnp.abs(mu - ref_mu))) < 5e-2
    assert float(jnp.max(jnp.abs(logvar - ref_lv))) < 5e-2

    print("KERNEL_OK")
</pallas_src>

<mosaic_0001>
module attributes {stable_mosaic.version = 11 : i64} {
  func.func @vae_kernel(%arg0: i32, %arg1: memref<8x896xbf16, #tpu.memory_space<vmem>>, %arg2: memref<896x64xbf16, #tpu.memory_space<vmem>>, %arg3: memref<64x128xbf16, #tpu.memory_space<vmem>>, %arg4: memref<128x64xbf16, #tpu.memory_space<vmem>>, %arg5: memref<64x896xbf16, #tpu.memory_space<vmem>>, %arg6: memref<1x1280xf32, #tpu.memory_space<vmem>>, %arg7: memref<8x896xf32, #tpu.memory_space<vmem>>, %arg8: memref<8x128xf32, #tpu.memory_space<vmem>>) attributes {dimension_semantics = [#tpu.dimension_semantics<parallel>], iteration_bounds = array<i64: 2>, scalar_prefetch = 0 : i64, scratch_operands = 0 : i64, tpu.core_type = #tpu.core_type<tc>, window_params = [{transform_indices = @transform_0, window_bounds = array<i64: 8, 896>}, {pipeline_mode = #tpu.pipeline_mode<synchronous>, transform_indices = @transform_1, window_bounds = array<i64: 896, 64>}, {pipeline_mode = #tpu.pipeline_mode<synchronous>, transform_indices = @transform_2, window_bounds = array<i64: 64, 128>}, {pipeline_mode = #tpu.pipeline_mode<synchronous>, transform_indices = @transform_3, window_bounds = array<i64: 128, 64>}, {pipeline_mode = #tpu.pipeline_mode<synchronous>, transform_indices = @transform_4, window_bounds = array<i64: 64, 896>}, {pipeline_mode = #tpu.pipeline_mode<synchronous>, transform_indices = @transform_5, window_bounds = array<i64: 1, 1280>}, {transform_indices = @transform_6, window_bounds = array<i64: 8, 896>}, {transform_indices = @transform_7, window_bounds = array<i64: 8, 128>}]} {
    %c0 = arith.constant 0 : index
    %c0_0 = arith.constant 0 : index
    %0 = vector.load %arg6[%c0, %c0_0] : memref<1x1280xf32, #tpu.memory_space<vmem>>, vector<1x64xf32>
    %c0_1 = arith.constant 0 : index
    %c128 = arith.constant 128 : index
    %1 = vector.load %arg6[%c0_1, %c128] : memref<1x1280xf32, #tpu.memory_space<vmem>>, vector<1x64xf32>
    %c0_2 = arith.constant 0 : index
    %c256 = arith.constant 256 : index
    %2 = vector.load %arg6[%c0_2, %c256] : memref<1x1280xf32, #tpu.memory_space<vmem>>, vector<1x128xf32>
    %c0_3 = arith.constant 0 : index
    %c384 = arith.constant 384 : index
    %3 = vector.load %arg6[%c0_3, %c384] : memref<1x1280xf32, #tpu.memory_space<vmem>>, vector<1x896xf32>
    %c0_4 = arith.constant 0 : index
    %c0_5 = arith.constant 0 : index
    %4 = vector.load %arg1[%c0_4, %c0_5] : memref<8x896xbf16, #tpu.memory_space<vmem>>, vector<8x896xbf16>
    %c0_6 = arith.constant 0 : index
    %c0_7 = arith.constant 0 : index
    %5 = vector.load %arg2[%c0_6, %c0_7] : memref<896x64xbf16, #tpu.memory_space<vmem>>, vector<896x64xbf16>
    %cst = arith.constant dense<0.000000e+00> : vector<8x64xf32>
    %6 = tpu.matmul %4, %5, %cst {dimension_numbers = #tpu.dot_dimension_numbers<[1], [0], [0], [1], [0, 0, 1, 1], [], []>} : vector<8x896xbf16>, vector<896x64xbf16>, vector<8x64xf32> -> vector<8x64xf32>
    %7 = vector.broadcast %0 : vector<1x64xf32> to vector<8x64xf32>
    %8 = arith.addf %6, %7 : vector<8x64xf32>
    %cst_8 = arith.constant 0.000000e+00 : f32
    %9 = vector.broadcast %cst_8 : f32 to vector<8x64xf32>
    %10 = arith.maximumf %8, %9 : vector<8x64xf32>
    %11 = arith.truncf %10 : vector<8x64xf32> to vector<8x64xbf16>
    %c0_9 = arith.constant 0 : index
    %c0_10 = arith.constant 0 : index
    %12 = vector.load %arg3[%c0_9, %c0_10] : memref<64x128xbf16, #tpu.memory_space<vmem>>, vector<64x128xbf16>
    %cst_11 = arith.constant dense<0.000000e+00> : vector<8x128xf32>
    %13 = tpu.matmul %11, %12, %cst_11 {dimension_numbers = #tpu.dot_dimension_numbers<[1], [0], [0], [1], [0, 0, 1, 1], [], []>} : vector<8x64xbf16>, vector<64x128xbf16>, vector<8x128xf32> -> vector<8x128xf32>
    %14 = vector.broadcast %2 : vector<1x128xf32> to vector<8x128xf32>
    %15 = arith.addf %13, %14 : vector<8x128xf32>
    %cst_12 = arith.constant 0.000000e+00 : f32
    %16 = vector.broadcast %cst_12 : f32 to vector<8x128xf32>
    %17 = arith.maximumf %15, %16 : vector<8x128xf32>
    %18 = arith.truncf %17 : vector<8x128xf32> to vector<8x128xbf16>
    %c0_13 = arith.constant 0 : index
    %c0_14 = arith.constant 0 : index
    %19 = vector.load %arg4[%c0_13, %c0_14] : memref<128x64xbf16, #tpu.memory_space<vmem>>, vector<128x64xbf16>
    %cst_15 = arith.constant dense<0.000000e+00> : vector<8x64xf32>
    %20 = tpu.matmul %18, %19, %cst_15 {dimension_numbers = #tpu.dot_dimension_numbers<[1], [0], [0], [1], [0, 0, 1, 1], [], []>} : vector<8x128xbf16>, vector<128x64xbf16>, vector<8x64xf32> -> vector<8x64xf32>
    %21 = vector.broadcast %1 : vector<1x64xf32> to vector<8x64xf32>
    %22 = arith.addf %20, %21 : vector<8x64xf32>
    %cst_16 = arith.constant 0.000000e+00 : f32
    %23 = vector.broadcast %cst_16 : f32 to vector<8x64xf32>
    %24 = arith.maximumf %22, %23 : vector<8x64xf32>
    %25 = arith.truncf %24 : vector<8x64xf32> to vector<8x64xbf16>
    %c0_17 = arith.constant 0 : index
    %c0_18 = arith.constant 0 : index
    %26 = vector.load %arg5[%c0_17, %c0_18] : memref<64x896xbf16, #tpu.memory_space<vmem>>, vector<64x896xbf16>
    %cst_19 = arith.constant dense<0.000000e+00> : vector<8x896xf32>
    %27 = tpu.matmul %25, %26, %cst_19 {dimension_numbers = #tpu.dot_dimension_numbers<[1], [0], [0], [1], [0, 0, 1, 1], [], []>} : vector<8x64xbf16>, vector<64x896xbf16>, vector<8x896xf32> -> vector<8x896xf32>
    %28 = vector.broadcast %3 : vector<1x896xf32> to vector<8x896xf32>
    %29 = arith.addf %27, %28 : vector<8x896xf32>
    %30 = arith.negf %29 : vector<8x896xf32>
    %31 = math.exp %30 : vector<8x896xf32>
    %cst_20 = arith.constant 1.000000e+00 : f32
    %32 = vector.broadcast %cst_20 : f32 to vector<8x896xf32>
    %33 = arith.addf %32, %31 : vector<8x896xf32>
    %34 = arith.divf %32, %33 : vector<8x896xf32>
    %c0_21 = arith.constant 0 : index
    %c0_22 = arith.constant 0 : index
    %35 = vector.load %arg7[%c0_21, %c0_22] : memref<8x896xf32, #tpu.memory_space<vmem>>, vector<8x896xf32>
    tpu.vector_store %arg7[%c0_21, %c0_22], %34 {strides = array<i32>} : memref<8x896xf32, #tpu.memory_space<vmem>>, vector<8x896xf32>,
    %c0_23 = arith.constant 0 : index
    %c0_24 = arith.constant 0 : index
    %36 = vector.load %arg8[%c0_23, %c0_24] : memref<8x128xf32, #tpu.memory_space<vmem>>, vector<8x128xf32>
    tpu.vector_store %arg8[%c0_23, %c0_24], %17 {strides = array<i32>} : memref<8x128xf32, #tpu.memory_space<vmem>>, vector<8x128xf32>,
    return
  }
  func.func @transform_0(%arg0: i32) -> (i32, i32) {
    %c0_i32 = arith.constant 0 : i32
    %c0_i32_0 = arith.constant 0 : i32
    return %arg0, %c0_i32 : i32, i32
  }
  func.func @transform_1(%arg0: i32) -> (i32, i32) {
    %c0_i32 = arith.constant 0 : i32
    %c0_i32_0 = arith.constant 0 : i32
    %c0_i32_1 = arith.constant 0 : i32
    return %c0_i32, %c0_i32_0 : i32, i32
  }
  func.func @transform_2(%arg0: i32) -> (i32, i32) {
    %c0_i32 = arith.constant 0 : i32
    %c0_i32_0 = arith.constant 0 : i32
    %c0_i32_1 = arith.constant 0 : i32
    return %c0_i32, %c0_i32_0 : i32, i32
  }
  func.func @transform_3(%arg0: i32) -> (i32, i32) {
    %c0_i32 = arith.constant 0 : i32
    %c0_i32_0 = arith.constant 0 : i32
    %c0_i32_1 = arith.constant 0 : i32
    return %c0_i32, %c0_i32_0 : i32, i32
  }
  func.func @transform_4(%arg0: i32) -> (i32, i32) {
    %c0_i32 = arith.constant 0 : i32
    %c0_i32_0 = arith.constant 0 : i32
    %c0_i32_1 = arith.constant 0 : i32
    return %c0_i32, %c0_i32_0 : i32, i32
  }
  func.func @transform_5(%arg0: i32) -> (i32, i32) {
    %c0_i32 = arith.constant 0 : i32
    %c0_i32_0 = arith.constant 0 : i32
    %c0_i32_1 = arith.constant 0 : i32
    return %c0_i32, %c0_i32_0 : i32, i32
  }
  func.func @transform_6(%arg0: i32) -> (i32, i32) {
    %c0_i32 = arith.constant 0 : i32
    %c0_i32_0 = arith.constant 0 : i32
    return %arg0, %c0_i32 : i32, i32
  }
  func.func @transform_7(%arg0: i32) -> (i32, i32) {
    %c0_i32 = arith.constant 0 : i32
    %c0_i32_0 = arith.constant 0 : i32
    return %arg0, %c0_i32 : i32, i32
  }
}

</mosaic_0001>

<bundles_post_ra>
// kernel: vae_forward.1
= control target key start
LH: loop header
LB: loop body
LE: loop exit
PB: predicated region body
PF: predicated region fallthrough
CT: control target
= control target key end

     0   :  { %13 = vsyncpa [#allocation3], 0  ;;  %s2721_s0 = inlined_call_operand.vmem [shape: bf16[16,896], index: 0, kind: input, shape index: {}]   ;;  %s2722_s1 = inlined_call_operand.vmem [shape: bf16[896,64], index: 1, kind: input, shape index: {}]   ;;  %s2723_s2 = inlined_call_operand.vmem [shape: bf16[64,128], index: 2, kind: input, shape index: {}]   ;;  %s2724_s3 = inlined_call_operand.vmem [shape: bf16[128,64], index: 3, kind: input, shape index: {}]   ;;  %s2725_s4 = inlined_call_operand.vmem [shape: bf16[64,896], index: 4, kind: input, shape index: {}]   ;;  %s2726_s5 = inlined_call_operand.vmem [shape: f32[1,1280], index: 5, kind: input, shape index: {}]   ;;  %s2727_s6 = inlined_call_operand.hbm [shape: f32[16,896], index: 6, kind: output, shape index: {0}]   ;;  %s2728_s7 = inlined_call_operand.vmem [shape: f32[16,128], index: 7, kind: output, shape index: {1}]  }
   0x1   :  { %15 = vsyncpa [#allocation3 + $0x1], 0  ;;  %s2248_s24 = smov 0   ;;  %s2250_s25 = smov 0  }
   0x2   :  { %s2252_s26 = smov 0   ;;  %s2254_s27 = smov 0  }
   0x3 LB: > { %s2269_s28 = sadd.s32 4294967295, %s2202_s27   ;;  %s1667_s29 = sadd.s32 4294967294, %s2202_s27   ;;  %s2202_s27 = sphi %s2254_s27, %s2734_s27   ;;  %s2198_s26 = sphi %s2252_s26, %s2733_s26   ;;  %s2194_s25 = sphi %s2250_s25, %s2732_s25   ;;  %s2190_s24 = sphi %s2248_s24, %s2731_s24  }
   0x4   : > { %s2273_s30 = sadd.s32 1, %s2202_s27   ;;  %s159_s8 = sadd.s32 1, %s2198_s26 }
   0x5   : > { %s156_s9 = ssub.s32 %s2202_s27, %s2273_s30  ;;  %p169_p0 = scmp.ne.s32.totalorder %s2198_s26, %s2194_s25 }
   0x6   : > { %p157_p1 = scmp.eq.s32.totalorder %s156_s9, 0  ;;  %p170_p2 = scmp.eq.s32.totalorder %s2269_s28, 1 }
   0x7   : > { %p175_p3 = scmp.ne.s32.totalorder %s2194_s25, %s2190_s24  ;;  %p176_p4 = scmp.eq.s32.totalorder %s1667_s29, 1 }
   0x8   : > { %s2284_s10 = scalar_select %p157_p1, %s2198_s26, %s159_s8  }
   0x9   : > { %p2286_p5 = por %p170_p2, %p169_p0  ;;  %p2290_p6 = por %p176_p4, %p175_p3 }
   0xa   : > { %p1670_p7 = scmp.ge.s32.totalorder %s2202_s27, 1  ;;  %p243_p8 = scmp.lt.s32.totalorder %s2202_s27, 3 }
   0xc   : > { %p244_p9 = pnand %p1670_p7, %p243_p8 }
   0xd   : > { %v1997_v0 = vld [vmem:[%s2722_s1 + $0x40] sm:$0xff] (!%p244_p9)   ;;  %v2001_v4 = vld [vmem:[%s2722_s1 + $0x48] sm:$0xff] (!%p244_p9)   ;;  %v2005_v8 = vld [vmem:[%s2722_s1 + $0x50] sm:$0xff] (!%p244_p9)   ;;  %p279_p10 = scmp.lt.s32.totalorder (!%p244_p9), %s2269_s28, 1  ;;  %v2204_v42 = vmov (!%p244_p9), 0.0   ;;  %vm2205_vm0 = vmmov (!%p244_p9), 0  }
   0xe   : > { %247 = sbr.rel (%p244_p9) target bundleno = 1023 (0x3ff), region = 44  ;;  %v1998_v1 = vld [vmem:[%s2722_s1] sm:$0xff] (!%p244_p9)   ;;  %1794 = vmatprep.subr.bf16.mxu0 (!%p244_p9), %v1997_v0  ;;  %v2002_v5 = vld [vmem:[%s2722_s1 + $0x8] sm:$0xff] (!%p244_p9)   ;;  %v2006_v9 = vld [vmem:[%s2722_s1 + $0x10] sm:$0xff] (!%p244_p9)   ;;  %vm976_vm1 = vcmask (!%p244_p9), 523264  }
   0xf   : > { %v1999_v2 = vld [vmem:[%s2722_s1 + $0xc0] sm:$0xff] (!%p244_p9)   ;;  %1795 = vmatpush3.bf16.msra.mxu0 (!%p244_p9), %v1998_v1  ;;  %v2003_v6 = vld [vmem:[%s2722_s1 + $0xc8] sm:$0xff] (!%p244_p9)   ;;  %v2007_v10 = vld [vmem:[%s2722_s1 + $0xd0] sm:$0xff] (!%p244_p9)   ;;  %s1954_s14 = smul.u32 (!%p244_p9), 896, %s2269_s28 }
  0x10   : > { %v2000_v3 = vld [vmem:[%s2722_s1 + $0x80] sm:$0xff] (!%p244_p9)   ;;  %1816 = vmatprep.subr.bf16.mxu1 (!%p244_p9), %v1999_v2  ;;  %1796 = vmatprep.subr.bf16.mxu0 (!%p244_p9), %v2001_v4  ;;  %v2004_v7 = vld [vmem:[%s2722_s1 + $0x88] sm:$0xff] (!%p244_p9)   ;;  %v2008_v11 = vld [vmem:[%s2722_s1 + $0x90] sm:$0xff] (!%p244_p9)  }
  0x11   : > { %1817 = vmatpush3.bf16.msra.mxu1 (!%p244_p9), %v2000_v3  ;;  %v2009_v12 = vld [vmem:[%s2722_s1 + $0x58] sm:$0xff] (!%p244_p9)   ;;  %v2013_v16 = vld [vmem:[%s2722_s1 + $0x60] sm:$0xff] (!%p244_p9)   ;;  %v2017_v20 = vld [vmem:[%s2722_s1 + $0x68] sm:$0xff] (!%p244_p9)   ;;  %s2676_s17 = scalar_lea.hbm (!%p244_p9), %s2727_s6, %s1954_s14 }
  0x12   : > { %1818 = vmatprep.subr.bf16.mxu1 (!%p244_p9), %v2003_v6  ;;  %v2010_v13 = vld [vmem:[%s2722_s1 + $0x18] sm:$0xff] (!%p244_p9)   ;;  %v2014_v17 = vld [vmem:[%s2722_s1 + $0x20] sm:$0xff] (!%p244_p9)   ;;  %v2018_v21 = vld [vmem:[%s2722_s1 + $0x28] sm:$0xff] (!%p244_p9)  }
  0x13   : > { %1797 = vmatpush3.bf16.msra.mxu0 (!%p244_p9), %v2002_v5  ;;  %v2011_v14 = vld [vmem:[%s2722_s1 + $0xd8] sm:$0xff] (!%p244_p9)   ;;  %v2015_v18 = vld [vmem:[%s2722_s1 + $0xe0] sm:$0xff] (!%p244_p9)   ;;  %v2019_v22 = vld [vmem:[%s2722_s1 + $0xe8] sm:$0xff] (!%p244_p9)  }
  0x14   : > { %1798 = vmatprep.subr.bf16.mxu0 (!%p244_p9), %v2005_v8  ;;  %v2012_v15 = vld [vmem:[%s2722_s1 + $0x98] sm:$0xff] (!%p244_p9)   ;;  %v2016_v19 = vld [vmem:[%s2722_s1 + $0xa0] sm:$0xff] (!%p244_p9)   ;;  %v2020_v23 = vld [vmem:[%s2722_s1 + $0xa8] sm:$0xff] (!%p244_p9)  }
  0x15   : > { %1819 = vmatpush3.bf16.msra.mxu1 %v2004_v7  ;;  %s2361_s13 = scalar_select %p279_p10, %s2269_s28, 1  ;;  %v2021_v24 = vld [vmem:[%s2722_s1 + $0x70] sm:$0xff]   ;;  %v2025_v28 = vld [vmem:[%s2722_s1 + $0x78] sm:$0xff]   ;;  %v2031_v35 = vld [vmem:[%s2722_s1 + $0x140] sm:$0xff]  }
  0x16   : > { %1820 = vmatprep.subr.bf16.mxu1 %v2007_v10  ;;  %v2022_v25 = vld [vmem:[%s2722_s1 + $0x30] sm:$0xff]   ;;  %v2026_v29 = vld [vmem:[%s2722_s1 + $0x38] sm:$0xff]   ;;  %v2034_v39 = vld [vmem:[%s2722_s1 + $0x100] sm:$0xff]   ;;  %s2207_s28 = smov [#allocation2]  }
  0x17   : > { %1799 = vmatpush3.bf16.msra.mxu0 %v2006_v9  ;;  %s1953_s22 = smul.u32 28, %s2361_s13  ;;  %v2023_v26 = vld [vmem:[%s2722_s1 + $0xf0] sm:$0xff]   ;;  %v2027_v30 = vld [vmem:[%s2722_s1 + $0xf8] sm:$0xff]   ;;  %v2035_v40 = vld [vmem:[%s2722_s1 + $0x180] sm:$0xff]   ;;  %s1672_s16 = sshll.u32 %s2361_s13, 3 }
  0x18   : > { %1800 = vmatprep.subr.bf16.mxu0 %v2009_v12  ;;  %v2024_v27 = vld [vmem:[%s2722_s1 + $0xb0] sm:$0xff]   ;;  %v2030_v34 = vld [vmem:[%s2722_s1 + $0xb8] sm:$0xff]   ;;  %v2036_v41 = vld [vmem:[%s2722_s1 + $0x148] sm:$0xff]   ;;  %s287_s19 = scalar_lea.vmem %s2728_s7, %s1672_s16  ;;  %s270_s13 = sand.u32 1, %s2194_s25  }
  0x19   : > { %1821 = vmatpush3.bf16.msra.mxu1 %v2008_v11  ;;  %s2391_s20 = scalar_lea.vmem %s2721_s0, %s1953_s22  ;;  %v2037_v43 = vld [vmem:[%s2722_s1 + $0x108] sm:$0xff]   ;;  %v2039_v45 = vld [vmem:[%s2722_s1 + $0x150] sm:$0xff]   ;;  %v2042_v48 = vld [vmem:[%s2722_s1 + $0x158] sm:$0xff]   ;;  %s1952_s9 = smul.u32 56, %s270_s13 }
  0x1a   : > { %1822 = vmatprep.subr.bf16.mxu1 %v2011_v14  ;;  %v293_v31 = vld [vmem:[%s2391_s20] sm:$0xff]  ;;  %v294_v36 = vld [vmem:[%s2391_s20 + $0x8] sm:$0xff]  ;;  %v2040_v46 = vld [vmem:[%s2722_s1 + $0x110] sm:$0xff]   ;;  %s1563_s18 = scalar_lea.sflag [#allocation3], %s270_s13  ;;  %s2144_s21 = sshll.u32 %s2207_s28, 4  ;;  %s2145_s21 = int_to_ptr.vmem [resolvable:$false] %s2144_s21 }
  0x1b   : > { %1801 = vmatpush3.bf16.msra.mxu0 %v2010_v13  ;;  %v1674_v32 = vcombine.low %v293_v31, %v293_v31  ;;  %v1675_v33 = vcombine.high %v293_v31, %v293_v31  ;;  %v1676_v37 = vcombine.low %v294_v36, %v294_v36  ;;  %v1677_v38 = vcombine.high %v294_v36, %v294_v36  ;;  %v2038_v44 = vld [vmem:[%s2722_s1 + $0x188] sm:$0xff]   ;;  %v2041_v47 = vld [vmem:[%s2722_s1 + $0x190] sm:$0xff]   ;;  %v2043_v49 = vld [vmem:[%s2722_s1 + $0x118] sm:$0xff]   ;;  %s2663_s22 = scalar_lea.vmem [#allocation2], %s1952_s9  ;;  %s2146_s23 = scalar_lea.vmem %s2145_s21, 1792 }
  0x1c   : > { %1802 = vmatprep.subr.bf16.mxu0 %v2013_v16  ;;  %v2045_v50 = vld [vmem:[%s2722_s1 + $0x160] sm:$0xff]   ;;  %v2044_v51 = vld [vmem:[%s2722_s1 + $0x198] sm:$0xff]   ;;  %v2048_v53 = vld [vmem:[%s2722_s1 + $0x168] sm:$0xff]   ;;  %s1581_s15 = sshll.u32 %s2663_s22, 4  ;;  %s2678_s15 = int_to_ptr.vmem [resolvable:$true] %s1581_s15 }
  0x1d   : > { %1823 = vmatpush3.bf16.msra.mxu1 %v2012_v15  ;;  %808 = vmatprep.mubr.bf16.mxu0 %v1675_v33  ;;  %v2046_v52 = vld [vmem:[%s2722_s1 + $0x120] sm:$0xff]   ;;  %v2049_v55 = vld [vmem:[%s2722_s1 + $0x128] sm:$0xff]   ;;  %v2051_v56 = vld [vmem:[%s2722_s1 + $0x170] sm:$0xff]   ;;  %p2147_p0 = scmp.lt.s32.totalorder %s2678_s15, %s2145_s21 }
  0x1e   : > { %1824 = vmatprep.subr.bf16.mxu1 %v2015_v18  ;;  %848 = vmatprep.mubr.bf16.mxu1 %v1677_v38  ;;  %v2047_v54 = vld [vmem:[%s2722_s1 + $0x1a0] sm:$0xff]   ;;  %v2050_v57 = vld [vmem:[%s2722_s1 + $0x1a8] sm:$0xff]   ;;  %v2052_v58 = vld [vmem:[%s2722_s1 + $0x130] sm:$0xff]  }
  0x1f   : > { %1803 = vmatpush3.bf16.msra.mxu0 %v2014_v17  ;;  %v295_v59 = vld [vmem:[%s2391_s20 + $0x10] sm:$0xff]  ;;  %v2054_v62 = vld [vmem:[%s2722_s1 + $0x178] sm:$0xff]   ;;  %v2060_v3 = vld [vmem:[%s2723_s2] sm:$0xff]  }
  0x20   : > { %1804 = vmatprep.subr.bf16.mxu0 %v2017_v20  ;;  %v2053_v60 = vld [vmem:[%s2722_s1 + $0x1b0] sm:$0xff]   ;;  %v1679_v61 = vcombine.high %v295_v59, %v295_v59  ;;  %v2055_v63 = vld [vmem:[%s2722_s1 + $0x138] sm:$0xff]   ;;  %v1678_v1 = vcombine.low %v295_v59, %v295_v59  ;;  %v2061_v4 = vld [vmem:[%s2723_s2 + $0x8] sm:$0xff]  }
  0x21   : > { %1825 = vmatpush3.bf16.msra.mxu1 %v2016_v19  ;;  %v2058_v0 = vld [vmem:[%s2722_s1 + $0x1b8] sm:$0xff]   ;;  %v2062_v5 = vld [vmem:[%s2723_s2 + $0x10] sm:$0xff]   ;;  %v2064_v7 = vld [vmem:[%s2724_s3] sm:$0xff]  }
  0x22   : > { %1826 = vmatprep.subr.bf16.mxu1 %v2019_v22  ;;  %v2059_v2 = vld [vmem:[%s2391_s20 + $0x18] ss:$0 sps:$4 sm:$0xff]   ;;  %v2065_v8 = vld [vmem:[%s2724_s3 + $0x8] sm:$0xff]   ;;  %v2066_v9 = vld [vmem:[%s2724_s3 + $0x10] sm:$0xff]  }
  0x23   : > { %1805 = vmatpush3.bf16.msra.mxu0 %v2018_v21  ;;  %v2063_v6 = vld [vmem:[%s2723_s2 + $0x18] sm:$0xff]   ;;  %v2068_v11 = vld [vmem:[%s2724_s3 + $0x20] sm:$0xff]   ;;  %v2069_v12 = vld [vmem:[%s2724_s3 + $0x28] sm:$0xff]  }
  0x24   : > { %1806 = vmatprep.subr.bf16.mxu0 %v2021_v24  ;;  %v2067_v10 = vld [vmem:[%s2724_s3 + $0x18] sm:$0xff]   ;;  %v1673_v14 = vld [vmem:[%s2726_s5] ss:$0 sm:$0xff]  ;;  %v2081_v59 = vld [vmem:[%s2725_s4 + $0x48] ss:$28 sps:$4 sm:$0xff]  }
  0x25   : > { %1827 = vmatpush3.bf16.msra.mxu1 %v2020_v23 }
  0x26   : > { %1828 = vmatprep.subr.bf16.mxu1 %v2023_v26 }
  0x27   : > { %1807 = vmatpush3.bf16.msra.mxu0 %v2022_v25 }
  0x28   : > { %1808 = vmatprep.subr.bf16.mxu0 %v2025_v28 }
  0x29   : > { %1829 = vmatpush3.bf16.msra.mxu1 %v2024_v27 }
  0x2a   : > { %1830 = vmatprep.subr.bf16.mxu1 %v2027_v30 }
  0x2b   : > { %1809 = vmatpush3.bf16.msra.mxu0 %v2026_v29 }
  0x2c   : > { %1838 = vmatprep.subr.bf16.mxu0 %v2031_v35 }
  0x2d   : > { %1831 = vmatpush3.bf16.msra.mxu1 %v2030_v34 }
  0x2e   : > { %809 = vmatmul.mubr.bf16.vlgmr.msra.gmra.mrb[0].mxu0 %v1674_v32  ;;  %1888 = vmatprep.subr.bf16.mxu1 %v2204_v42 }
  0x2f   : > { %1839 = vmatpush3.bf16.msra.mxu0 %v2034_v39  ;;  %888 = vmatprep.mubr.bf16.mxu0 %v1679_v61  ;;  %v2070_v39 = vld [vmem:[%s2724_s3 + $0x30] sm:$0xff]   ;;  %v2087_v61 = vld [vmem:[%s2725_s4 + $0x80] ss:$28 sps:$4 sm:$0xff]  }
  0x30   : > { %849 = vmatmul.mubr.bf16.vlgmr.msra.gmra.mrb[0].mxu1 %v1676_v37  ;;  %1840 = vmatprep.subr.bf16.mxu0 %v2036_v41  ;;  %v2072_v41 = vld [vmem:[%s2725_s4] ss:$28 sps:$4 sm:$0xff]  }
  0x31   : > { %1889 = vmatpush3.bf16.msra.mxu1 %v2035_v40  ;;  %1904 = vmatprep.mubr.msk.bf16.mxu1 %vm2205_vm0, %v2204_v42  ;;  %v2071_v40 = vld [vmem:[%s2724_s3 + $0x38] sm:$0xff]  }
  0x32   : > { %1890 = vmatprep.subr.bf16.mxu1 %v2204_v42 }
  0x33   : > { %1841 = vmatpush3.bf16.msra.mxu0 %v2037_v43  ;;  %v2074_v43 = vld [vmem:[%s2725_s4 + $0x4] ss:$28 sps:$4 sm:$0xff]  }
  0x34   : > { %1842 = vmatprep.subr.bf16.mxu0 %v2039_v45  ;;  %v2080_v45 = vld [vmem:[%s2725_s4 + $0x3c] ss:$28 sps:$4 sm:$0xff]  }
  0x35   : > { %1891 = vmatpush3.bf16.msra.mxu1 %v2038_v44  ;;  %v2077_v44 = vld [vmem:[%s2725_s4 + $0x14] ss:$28 sps:$4 sm:$0xff]  }
  0x36   : > { %1892 = vmatprep.subr.bf16.mxu1 %v2204_v42 }
  0x37   : > { %1843 = vmatpush3.bf16.msra.mxu0 %v2040_v46  ;;  %v2078_v46 = vld [vmem:[%s2725_s4 + $0x38] ss:$28 sps:$4 sm:$0xff]  }
  0x38   : > { %1844 = vmatprep.subr.bf16.mxu0 %v2042_v48  ;;  %v2084_v48 = vld [vmem:[%s2725_s4 + $0x70] ss:$28 sps:$4 sm:$0xff]  }
  0x39   : > { %1893 = vmatpush3.bf16.msra.mxu1 %v2041_v47  ;;  %v2086_v47 = vld [vmem:[%s2725_s4 + $0x74] ss:$28 sps:$4 sm:$0xff]  }
  0x3a   : > { %1894 = vmatprep.subr.bf16.mxu1 %v2204_v42 }
  0x3b   : > { %1845 = vmatpush3.bf16.msra.mxu0 %v2043_v49  ;;  %v1737_v49 = vld [vmem:[%s2726_s5 + $0x2] ss:$0 sm:$0xff] }
  0x3c   : > { %1846 = vmatprep.subr.bf16.mxu0 %v2045_v50 }
  0x3d   : > { %1895 = vmatpush3.bf16.msra.mxu1 %v2044_v51 }
  0x3e   : > { %1896 = vmatprep.subr.bf16.mxu1 %v2204_v42 }
  0x3f   : > { %1847 = vmatpush3.bf16.msra.mxu0 %v2046_v52 }
  0x40   : > { %1848 = vmatprep.subr.bf16.mxu0 %v2048_v53 }
  0x41   : > { %1897 = vmatpush3.bf16.msra.mxu1 %v2047_v54 }
  0x42   : > { %1898 = vmatprep.subr.bf16.mxu1 %v2204_v42 }
  0x43   : > { %1849 = vmatpush3.bf16.msra.mxu0 %v2049_v55 }
  0x44   : > { %1850 = vmatprep.subr.bf16.mxu0 %v2051_v56  ;;  %v2075_v56 = vld [vmem:[%s2725_s4 + $0x10] ss:$28 sps:$4 sm:$0xff]  }
  0x45   : > { %1899 = vmatpush3.bf16.msra.mxu1 %v2050_v57 }
  0x46   : > { %1900 = vmatprep.subr.bf16.mxu1 %v2204_v42 }
  0x47   : > { %1851 = vmatpush3.bf16.msra.mxu0 %v2052_v58  ;;  %v2083_v58 = vld [vmem:[%s2725_s4 + $0x4c] ss:$28 sps:$4 sm:$0xff]  }
  0x48   : > { %1852 = vmatprep.subr.bf16.mxu0 %v2054_v62  ;;  %v2092_v62 = vld [vmem:[%s2725_s4 + $0xac] ss:$28 sps:$4 sm:$0xff]  }
  0x49   : > { %1901 = vmatpush3.bf16.msra.mxu1 %v2053_v60  ;;  %v2089_v60 = vld [vmem:[%s2725_s4 + $0x84] ss:$28 sps:$4 sm:$0xff]  }
  0x4a   : > { %1902 = vmatprep.subr.bf16.mxu1 %v2204_v42 }
  0x4b   : > { %1853 = vmatpush3.bf16.msra.mxu0 %v2055_v63  ;;  %v2090_v63 = vld [vmem:[%s2725_s4 + $0xa8] ss:$28 sps:$4 sm:$0xff]  }
  0x4c   : > { %1908 = vmatprep.subr.bf16.mxu0 %v2204_v42 }
  0x4d   : > { %1903 = vmatpush3.bf16.msra.mxu1 %v2058_v0  ;;  %v2095_v0 = vld [vmem:[%s2725_s4 + $0xbc] ss:$28 sps:$4 sm:$0xff]  }
  0x4e   : > { %889 = vmatmul.mubr.bf16.vlgmr.msra.gmra.mrb[4].mxu0 %v1678_v1  ;;  %1920 = vmatprep.subr.bf16.mxu1 %v2204_v42  ;;  %v2093_v1 = vld [vmem:[%s2725_s4 + $0xb8] ss:$28 sps:$4 sm:$0xff]  }
  0x4f   : > { %1916 = vmatprep.mubr.msk.bf16.mxu0 %vm2205_vm0, %v2204_v42  ;;  %1909 = vmatpush3.bf16.msra.mxu0 %v2060_v3  ;;  %v2206_v3 = vmov 0  }
  0x50   : > { %1905 = vmatmul.mubr.bf16.vlgmr.msra.gmra.mrb[4].mxu1 %v2059_v2  ;;  %1910 = vmatprep.subr.bf16.mxu0 %v2204_v42  ;;  %v2098_v2 = vld [vmem:[%s2725_s4 + $0xc] ss:$28 sps:$4 sm:$0xff]  }
  0x51   : > { %1936 = vmatprep.mubr.msk.bf16.mxu1 %vm2205_vm0, %v2204_v42  ;;  %1921 = vmatpush3.bf16.msra.mxu1 %v2064_v7 }
  0x52   : > { %1922 = vmatprep.subr.bf16.mxu1 %v2204_v42 }
  0x53   : > { %1911 = vmatpush3.bf16.msra.mxu0 %v2061_v4  ;;  %v1743_v4 = vld [vmem:[%s2726_s5 + $0x1] ss:$0 sm:$0xff] }
  0x54   : > { %1912 = vmatprep.subr.bf16.mxu0 %v2204_v42 }
  0x55   : > { %1923 = vmatpush3.bf16.msra.mxu1 %v2065_v8 }
  0x56   : > { %1924 = vmatprep.subr.bf16.mxu1 %v2204_v42 }
  0x57   : > { %1913 = vmatpush3.bf16.msra.mxu0 %v2062_v5 }
  0x58   : > { %1914 = vmatprep.subr.bf16.mxu0 %v2204_v42 }
  0x59   : > { %1925 = vmatpush3.bf16.msra.mxu1 %v2066_v9 }
  0x5a   : > { %1926 = vmatprep.subr.bf16.mxu1 %v2204_v42 }
  0x5b   : > { %1915 = vmatpush3.bf16.msra.mxu0 %v2063_v6 }
  0x5c   : > { %1349 = vmatprep.subr.bf16.mxu0 %v2074_v43 }
  0x5d   : > { %1927 = vmatpush3.bf16.msra.mxu1 %v2067_v10 }
  0x5e   : > { %1928 = vmatprep.subr.bf16.mxu1 %v2204_v42 }
  0x61   : > { %1929 = vmatpush3.bf16.msra.mxu1 %v2068_v11  ;;  %v2096_v11 = vld [vmem:[%s2725_s4 + $0x8] ss:$28 sps:$4 sm:$0xff]  }
  0x62   : > { %1930 = vmatprep.subr.bf16.mxu1 %v2204_v42 }
  0x65   : > { %1931 = vmatpush3.bf16.msra.mxu1 %v2069_v12 }
  0x66   : > { %1932 = vmatprep.subr.bf16.mxu1 %v2204_v42 }
  0x69   : > { %1933 = vmatpush3.bf16.msra.mxu1 %v2070_v39 }
  0x6a   : > { %1934 = vmatprep.subr.bf16.mxu1 %v2204_v42 }
  0x6d   : > { %1935 = vmatpush3.bf16.msra.mxu1 %v2071_v40 }
  0x6e   : > { %1431 = vmatprep.subr.bf16.mxu1 %v2077_v44 }
 0x101   : > { %v1810_v13 = vpop.f32.mrb[0].mxu0 }
 0x102   : > { %v1811_v15 = vpop.f32.mrb[1].mxu0 }
 0x103   : > { %v1812_v16 = vadd.f32 %v1811_v15, %v1810_v13  ;;  %v1813_v17 = vpop.f32.mrb[2].mxu0  ;;  %v1832_v18 = vpop.f32.mrb[0].mxu1  ;;  %v2101_v13 = vld [vmem:[%s2725_s4 + $0x44] ss:$28 sps:$4 sm:$0xff]   ;;  %v2104_v15 = vld [vmem:[%s2725_s4 + $0x7c] ss:$28 sps:$4 sm:$0xff]  }
 0x104   : > { %v1814_v19 = vpop.f32.mrb[3].mxu0  ;;  %v1833_v20 = vpop.f32.mrb[1].mxu1  ;;  %v2107_v17 = vld [vmem:[%s2725_s4 + $0xb4] ss:$28 sps:$4 sm:$0xff]  }
 0x105   : > { %v811_v21 = vadd.f32 %v1812_v16, %v1673_v14  ;;  %v1834_v22 = vadd.f32 %v1833_v20, %v1832_v18  ;;  %v1835_v23 = vpop.f32.mrb[2].mxu1  ;;  %v2099_v14 = vld [vmem:[%s2725_s4 + $0x40] ss:$28 sps:$4 sm:$0xff]   ;;  %v2102_v16 = vld [vmem:[%s2725_s4 + $0x78] ss:$28 sps:$4 sm:$0xff]  }
 0x106   : > { %v1836_v24 = vpop.f32.mrb[3].mxu1  ;;  %v2105_v18 = vld [vmem:[%s2725_s4 + $0xb0] ss:$28 sps:$4 sm:$0xff]   ;;  %v2108_v19 = vld [vmem:[%s2725_s4 + $0x18] ss:$28 sps:$4 sm:$0xff]   ;;  %v1167_v23 = vlaneseq }
 0x107   : > { %v851_v25 = vadd.f32 %v1834_v22, %v811_v21  ;;  %v2109_v20 = vld [vmem:[%s2725_s4 + $0x50] ss:$28 sps:$4 sm:$0xff]   ;;  %v2110_v21 = vld [vmem:[%s2725_s4 + $0x88] ss:$28 sps:$4 sm:$0xff]   ;;  %v2111_v22 = vld [vmem:[%s2725_s4 + $0xc0] ss:$28 sps:$4 sm:$0xff]  }
 0x108   : > { %v2648_v24 = vshrl.u32 %v1167_v23, 7 }
 0x121   : > { %v1854_v26 = vpop.f32.mrb[4].mxu0 }
 0x122   : > { %v1855_v27 = vpop.f32.mrb[5].mxu0 }
 0x123   : > { %v1856_v28 = vadd.f32 %v1855_v27, %v1854_v26  ;;  %v1857_v29 = vpop.f32.mrb[6].mxu0  ;;  %v930_v30 = vpop.f32.mrb[4].mxu1  ;;  %v1185_v26 = vsub.s32 4, %v2648_v24  ;;  %v292_v27 = vld [vmem:[%s2726_s5 + $0x3] sm:$0xff] }
 0x124   : > { %v1858_v31 = vpop.f32.mrb[7].mxu0  ;;  %v1906_v32 = vpop.f32.mrb[5].mxu1  ;;  %v1189_v29 = vsub.s32 5, %v2648_v24 }
 0x125   : > { %v891_v33 = vadd.f32 %v1856_v28, %v851_v25  ;;  %v933_v34 = vpop.f32.mrb[6].mxu1  ;;  %v1169_v25 = vsub.s32 0, %v2648_v24  ;;  %v1173_v28 = vsub.s32 1, %v2648_v24 }
 0x126   : > { %v1907_v35 = vpop.f32.mrb[7].mxu1  ;;  %v1190_v32 = vrot.slane %v292_v27, %v1189_v29 }
 0x127   : > { %v931_v36 = vadd.f32 %v930_v30, %v891_v33  ;;  %v1170_v30 = vrot.slane %v292_v27, %v1169_v25  ;;  %v1174_v31 = vrot.slane %v292_v27, %v1173_v28 }
 0x129   : > { %v936_v37 = vmax.f32 %v931_v36, 0.0 }
 0x12b   : > { %v937_v38 = vpack.c.bf16 %v936_v37, %v936_v37 }
 0x12d   : > { %1917 = vmatmul.mubr.msk.bf16.vlgmr.msra.gmra.mrb[8].mxu0 %vm976_vm1, %v937_v38 }
 0x12e   : > { %1350 = vmatpush1.bf16.msra.mxu0 %v2072_v41  ;;  %1381 = vmatprep.mubr.bf16.mxu0 %v2206_v3 }
 0x12f   : > { %1351 = vmatprep.subr.bf16.mxu0 %v2080_v45 }
 0x132   : > { %1352 = vmatpush1.bf16.msra.mxu0 %v2078_v46 }
 0x133   : > { %1353 = vmatprep.subr.bf16.mxu0 %v2086_v47 }
 0x136   : > { %1354 = vmatpush1.bf16.msra.mxu0 %v2084_v48 }
 0x137   : > { %1355 = vmatprep.subr.bf16.mxu0 %v2092_v62 }
 0x13a   : > { %1356 = vmatpush1.bf16.msra.mxu0 %v2090_v63 }
 0x13b   : > { %1390 = vmatprep.subr.bf16.mxu0 %v2098_v2 }
 0x200   : > { %v1014_v50 = vpop.f32.mrb[8].mxu0 }
 0x201   : > { %v1015_v51 = vadd.f32 %v1737_v49, %v1014_v50  ;;  %v1918_v52 = vpop.f32.mrb[9].mxu0  ;;  %v1177_v50 = vsub.s32 2, %v2648_v24 }
 0x202   : > { %v1017_v53 = vpop.f32.mrb[10].mxu0 }
 0x203   : > { %v1020_v54 = vmax.f32 %v1015_v51, 0.0  ;;  %v1919_v55 = vpop.f32.mrb[11].mxu0  ;;  %v1181_v51 = vsub.s32 3, %v2648_v24  ;;  %v1178_v52 = vrot.slane %v292_v27, %v1177_v50 }
 0x205   : > { %v1021_v57 = vpack.c.bf16 %v1020_v54, %v1020_v54  ;;  %1561 = vst [vmem:[%s287_s19] sm:$0xff] %v1020_v54  ;;  %v1182_v53 = vrot.slane %v292_v27, %v1181_v51  ;;  %s2140_s19 = scalar_lea.vmem %s2678_s15, 896 }
 0x206   : > { %p2141_p11 = scmp.ne.s32.totalorder %s2678_s15, %s2140_s19  ;;  %p2148_p1 = scmp.lt.s32.totalorder %s2146_s23, %s2140_s19 }
 0x207   : > { %1937 = vmatmul.mubr.bf16.vlgmr.msra.gmra.mrb[8].mxu1 %v1021_v57 }
 0x208   : > { %1432 = vmatpush1.bf16.msra.mxu1 %v2075_v56  ;;  %1463 = vmatprep.mubr.bf16.mxu1 %v2206_v3  ;;  %p2142_p12 = pnand %p2141_p11, %p2286_p5  ;;  %p2149_p2 = por %p2148_p1, %p2147_p0 }
 0x209   : > { %1433 = vmatprep.subr.bf16.mxu1 %v2083_v58 }
 0x20a   : > { %p2143_p13 = pneg %p2142_p12 }
 0x20c   : > { %1434 = vmatpush1.bf16.msra.mxu1 %v2081_v59  ;;  %p2150_p3 = pnand %p2149_p2, %p2143_p13 }
 0x20d   : > { %1435 = vmatprep.subr.bf16.mxu1 %v2089_v60 }
 0x210   : > { %1436 = vmatpush1.bf16.msra.mxu1 %v2087_v61 }
 0x211   : > { %1437 = vmatprep.subr.bf16.mxu1 %v2095_v0 }
 0x214   : > { %1438 = vmatpush1.bf16.msra.mxu1 %v2093_v1 }
 0x2da   : > { %v1126_v5 = vpop.f32.mrb[8].mxu1 }
 0x2db   : > { %v1127_v6 = vadd.f32 %v1743_v4, %v1126_v5  ;;  %v1938_v7 = vpop.f32.mrb[9].mxu1 }
 0x2dc   : > { %v1129_v8 = vpop.f32.mrb[10].mxu1 }
 0x2dd   : > { %v1132_v9 = vmax.f32 %v1127_v6, 0.0  ;;  %v1939_v10 = vpop.f32.mrb[11].mxu1  ;;  %v1193_v6 = vsub.s32 6, %v2648_v24 }
 0x2df   : > { %v1133_v12 = vpack.c.bf16 %v1132_v9, %v1132_v9  ;;  %v1194_v9 = vrot.slane %v292_v27, %v1193_v6 }
 0x2e1   : > { %1780 = vmatmul.mubr.msk.bf16.vlgmr.msra.gmra.mrb[12].mxu0 %vm976_vm1, %v1133_v12  ;;  %1782 = vmatmul.mubr.msk.bf16.vlgmr.msra.gmra.mrb[12].mxu1 %vm976_vm1, %v1133_v12 }
 0x2e2   : > { %1391 = vmatpush1.bf16.msra.mxu0 %v2096_v11  ;;  %1422 = vmatprep.mubr.bf16.mxu0 %v2206_v3 }
 0x2e3   : > { %1392 = vmatprep.subr.bf16.mxu0 %v2101_v13 }
 0x2e6   : > { %1393 = vmatpush1.bf16.msra.mxu0 %v2099_v14 }
 0x2e7   : > { %1394 = vmatprep.subr.bf16.mxu0 %v2104_v15 }
 0x2ea   : > { %1395 = vmatpush1.bf16.msra.mxu0 %v2102_v16 }
 0x2eb   : > { %1396 = vmatprep.subr.bf16.mxu0 %v2107_v17 }
 0x2ee   : > { %1397 = vmatpush1.bf16.msra.mxu0 %v2105_v18 }
 0x2ef   : > { %1940 = vmatprep.subr.bf16.mxu0 %v2204_v42 }
 0x2f1   : > { %1781 = vmatmul.mubr.msk.bf16.vlgmr.msra.gmra.mrb[16].mxu0 %vm976_vm1, %v1133_v12 }
 0x2f2   : > { %1941 = vmatpush3.bf16.msra.mxu0 %v2108_v19  ;;  %1948 = vmatprep.mubr.msk.bf16.mxu0 %vm2205_vm0, %v2204_v42 }
 0x2f3   : > { %1942 = vmatprep.subr.bf16.mxu0 %v2204_v42 }
 0x2f6   : > { %1943 = vmatpush3.bf16.msra.mxu0 %v2109_v20 }
 0x2f7   : > { %1944 = vmatprep.subr.bf16.mxu0 %v2204_v42 }
 0x2fa   : > { %1945 = vmatpush3.bf16.msra.mxu0 %v2110_v21 }
 0x2fb   : > { %1946 = vmatprep.subr.bf16.mxu0 %v2204_v42  ;;  %v1186_v42 = vrot.slane %v292_v27, %v1185_v26 }
 0x2fe   : > { %1947 = vmatpush3.bf16.msra.mxu0 %v2111_v22 }
 0x301   : > { %1949 = vmatmul.mubr.msk.bf16.vlgmr.msra.gmra.mrb[20].mxu0 %vm976_vm1, %v1133_v12 }
 0x3b4   : > { %v1383_v33 = vpop.f32.mrb[12].mxu0  ;;  %v1465_v34 = vpop.f32.mrb[12].mxu1 }
 0x3b5   : > { %v1384_v35 = vadd.f32 %v1383_v33, %v1170_v30  ;;  %v1466_v36 = vadd.f32 %v1465_v34, %v1186_v42  ;;  %v1385_v37 = vpop.f32.mrb[13].mxu0  ;;  %v1467_v38 = vpop.f32.mrb[13].mxu1 }
 0x3b6   : > { %v1386_v39 = vadd.f32 %v1385_v37, %v1174_v31  ;;  %v1468_v40 = vadd.f32 %v1467_v38, %v1190_v32  ;;  %v1387_v41 = vpop.f32.mrb[14].mxu0  ;;  %v1469_v43 = vpop.f32.mrb[14].mxu1 }
 0x3b7   : > { %v1784_v44 = vmul.f32 -1.442695, %v1384_v35  ;;  %v1788_v45 = vmul.f32 -1.442695, %v1466_v36  ;;  %v1388_v46 = vpop.f32.mrb[15].mxu0  ;;  %v1470_v47 = vpop.f32.mrb[15].mxu1 }
 0x3b8   : > { %v1785_v48 = vmul.f32 -1.442695, %v1386_v39  ;;  %v1789_v49 = vmul.f32 -1.442695, %v1468_v40 }
 0x3b9   : > { %2112 = vpow2.f32 %v1784_v44 }
 0x3ba   : > { %2114 = vpow2.f32 %v1788_v45 }
 0x3bb   : > { %2116 = vpow2.f32 %v1785_v48 }
 0x3bc   : > { %2118 = vpow2.f32 %v1789_v49 }
 0x3c3   : > { %v2113_v54 = vpop.eup %2112 }
 0x3c4   : > { %v2115_v55 = vpop.eup %2114  ;;  %v1533_v56 = vadd.f32 1.0, %v2113_v54  ;;  %v1424_v57 = vpop.f32.mrb[16].mxu0 }
 0x3c5   : > { %v2117_v58 = vpop.eup %2116  ;;  %v1537_v59 = vadd.f32 1.0, %v2115_v55  ;;  %v1425_v60 = vadd.f32 %v1424_v57, %v1178_v52  ;;  %v1426_v61 = vpop.f32.mrb[17].mxu0 }
 0x3c6   : > { %v2119_v62 = vpop.eup %2118  ;;  %2120 = vrcp.f32 %v1533_v56  ;;  %v1534_v63 = vadd.f32 1.0, %v2117_v58  ;;  %v1427_v0 = vadd.f32 %v1426_v61, %v1182_v53  ;;  %v1428_v1 = vpop.f32.mrb[18].mxu0 }
 0x3c7   : > { %2122 = vrcp.f32 %v1537_v59  ;;  %v1538_v2 = vadd.f32 1.0, %v2119_v62  ;;  %v1786_v3 = vmul.f32 -1.442695, %v1425_v60  ;;  %v1429_v4 = vpop.f32.mrb[19].mxu0 }
 0x3c8   : > { %2124 = vrcp.f32 %v1534_v63  ;;  %v1787_v5 = vmul.f32 -1.442695, %v1427_v0 }
 0x3c9   : > { %2126 = vrcp.f32 %v1538_v2 }
 0x3ca   : > { %2128 = vpow2.f32 %v1786_v3 }
 0x3cb   : > { %2130 = vpow2.f32 %v1787_v5 }
 0x3d0   : > { %v2121_v7 = vpop.eup %2120 }
 0x3d1   : > { %v2123_v8 = vpop.eup %2122  ;;  %1554 = vst [vmem:[%s2663_s22] sm:$0xff] %v2121_v7 }
 0x3d2   : > { %v2125_v10 = vpop.eup %2124  ;;  %1558 = vst [vmem:[%s2663_s22 + $0x20] sm:$0xff] %v2123_v8 }
 0x3d3   : > { %v2127_v11 = vpop.eup %2126  ;;  %1555 = vst [vmem:[%s2663_s22 + $0x8] sm:$0xff] %v2125_v10 }
 0x3d4   : > { %v2129_v12 = vpop.eup %2128  ;;  %1559 = vst [vmem:[%s2663_s22 + $0x28] sm:$0xff] %v2127_v11  ;;  %v1506_v13 = vpop.f32.mrb[20].mxu0 }
 0x3d5   : > { %v2131_v14 = vpop.eup %2130  ;;  %v1535_v15 = vadd.f32 1.0, %v2129_v12  ;;  %v1507_v16 = vadd.f32 %v1506_v13, %v1194_v9  ;;  %v1950_v17 = vpop.f32.mrb[21].mxu0 }
 0x3d6   : > { %v1536_v18 = vadd.f32 1.0, %v2131_v14  ;;  %v1509_v19 = vpop.f32.mrb[22].mxu0 }
 0x3d7   : > { %2132 = vrcp.f32 %v1535_v15  ;;  %v1790_v20 = vmul.f32 -1.442695, %v1507_v16  ;;  %v1951_v21 = vpop.f32.mrb[23].mxu0 }
 0x3d8   : > { %2134 = vrcp.f32 %v1536_v18 }
 0x3d9   : > { %2136 = vpow2.f32 %v1790_v20 }
 0x3e1   : > { %v2133_v22 = vpop.eup %2132 }
 0x3e2   : > { %v2135_v23 = vpop.eup %2134  ;;  %1556 = vst [vmem:[%s2663_s22 + $0x10] sm:$0xff] %v2133_v22 }
 0x3e3   : > { %v2137_v24 = vpop.eup %2136  ;;  %1557 = vst [vmem:[%s2663_s22 + $0x18] sm:$0xff] %v2135_v23 }
 0x3e4   : > { %v1539_v25 = vadd.f32 1.0, %v2137_v24 }
 0x3e6   : > { %2138 = vrcp.f32 %v1539_v25 }
 0x3f0   : > { %v2139_v26 = vpop.eup %2138 }
 0x3f1   : > { %1560 = vst [vmem:[%s2663_s22 + $0x30] sm:$0xff] %v2139_v26 }
 0x3f2   : > { %2153 = shalt.err (!%p2150_p3)
}
 0x3f3   : > { %s2154_s29 = scalar_lea.hbm %s2676_s17, 896  ;;  %s2158_s9 = scalar_lea.hbm %s2727_s6, 1792 }
 0x3f4   : > { %p2155_p4 = scmp.ne.s32.totalorder %s2676_s17, %s2154_s29  ;;  %p2159_p9 = scmp.lt.u32.totalorder %s2676_s17, %s2727_s6 }
 0x3f5   : > { %p2160_p10 = scmp.lt.u32.totalorder %s2158_s9, %s2154_s29  ;;  %p2162_p12 = scmp.lt.u32.totalorder %s2154_s29, %s2676_s17 }
 0x3f6   : > { %p2156_p7 = pnand %p2155_p4, %p2286_p5 }
 0x3f7   : > { %p2161_p11 = por %p2160_p10, %p2159_p9 }
 0x3f8   : > { %p2157_p8 = pneg %p2156_p7 }
 0x3f9   : > { %p2163_p13 = por %p2162_p12, %p2161_p11 }
 0x3fb   : > { %p2164_p0 = pnand %p2163_p13, %p2157_p8 }
 0x3fd   : > { %2167 = shalt.err (!%p2164_p0)
}
 0x3fe   : > { %1955 = dma.vmem_to_hbm [thread:$0]  (%p2286_p5), %s2678_s15, 896, %s2676_s17, %s1563_s18  }
 0x3ff PF: > { %p1961_p1 = scmp.ge.s32.totalorder %s2202_s27, 2  ;;  %s1596_s20 = sand.u32 1, %s2190_s24  }
 0x400   : > { %s1597_s16 = scalar_lea.sflag [#allocation3], %s1596_s20 }
 0x401   : > { %p1958_p2 = pnand %p1961_p1, %p2290_p6 }
 0x403   : > { %2185 = dma.done.wait (!%p1958_p2), %s1597_s16, 896  }
 0x404   : > { %2187 = vsyncadd (!%p1958_p2), %s1597_s16, 4294966400  ;;  %p18_p3 = scmp.ge.s32.totalorder %s2273_s30, 4   ;;  %s2731_s24 = smov %s2194_s25 }
 0x405   : > { %s2732_s25 = smov %s2198_s26  ;;  %s2733_s26 = smov %s2284_s10 }
 0x406   : > { %s2734_s27 = smov %s2273_s30  ;;  %20 = sbr.rel (!%p18_p3) target bundleno = 3 (0x3), region = 91 }
 0x40d   :  { %1609 = vsyncpa [#allocation3], 1 }
 0x40e   :  { %1611 = vsyncpa [#allocation3 + $0x1], 1 }

</bundles_post_ra>
